<compile_context>
chip_gen: v7x
topology: tpu7x:2x2x1
jax: 0.10.0
libtpu: 0.0.40
codegen_flags: <defaults>
</compile_context>

<pallas_src>
import numpy as np
import jax
import jax.numpy as jnp
from jax import lax
from jax.experimental import pallas as pl
from jax.experimental.pallas import tpu as pltpu

_LANE = 128


def _round_up(v, m):
    return -(-v // m) * m


def _nearest_rows(h_in, h_out):
    return (np.arange(h_out) * h_in) // h_out


def _nearest_cols(w_in, w_out):
    return (np.arange(w_out) * w_in) // w_out


# ---------------------------------------------------------------------------
# Fast path: integer row scale (H_out % H_in == 0).  One matmul, 2-D slabs.
# ---------------------------------------------------------------------------
def _col_expand_kernel(x_ref, e_ref, o_ref):
    # x_ref: (block_rows, W_in), e_ref: (W_in, sh*W_out), o_ref: (block_rows, sh*W_out)
    o_ref[...] = jnp.dot(
        x_ref[...],
        e_ref[...],
        precision=lax.Precision.HIGHEST,
        preferred_element_type=jnp.float32,
    ).astype(o_ref.dtype)


def _choose_block_rows(total_rows, w_in, w_t, itemsize, budget_bytes=4 << 20):
    """Pick rows-per-block: fill a modest VMEM budget, keep >=2 grid steps."""
    per_row = (_round_up(w_in, _LANE) + _round_up(w_t, _LANE)) * itemsize
    rows = max(8, budget_bytes // max(per_row, 1))
    if rows >= total_rows:
        if total_rows >= 16:
            # split into ~2 blocks so both v7x TensorCores get work
            rows = min(total_rows, _round_up(-(-total_rows // 2), 8))
        else:
            rows = total_rows
    else:
        rows = (rows // 8) * 8
    return int(rows)


def _upsample_rows_integer(x, h_out, w_out):
    n, c, h_in, w_in = x.shape
    sh = h_out // h_in
    w_t = sh * w_out

    orig_dtype = x.dtype
    if jnp.issubdtype(orig_dtype, jnp.floating):
        compute_dtype = orig_dtype
    else:
        # TODO(synk): integer inputs with |x| >= 2^24 lose exactness on this f32 path.
        compute_dtype = jnp.float32
        x = x.astype(compute_dtype)

    # One-hot column selection, tiled sh times so each output "super-row"
    # (sh consecutive, identical output rows) is produced by one matmul.
    cols = _nearest_cols(w_in, w_out)
    col_idx = np.tile(cols, sh)
    e_np = np.zeros((w_in, w_t), dtype=np.float32)
    e_np[col_idx, np.arange(w_t)] = 1.0
    e = jnp.asarray(e_np, dtype=compute_dtype)

    total_rows = n * c * h_in
    x2d = x.reshape(total_rows, w_in)            # free, contiguous reshape

    itemsize = jnp.dtype(compute_dtype).itemsize
    block_rows = _choose_block_rows(total_rows, w_in, w_t, itemsize)
    grid = (pl.cdiv(total_rows, block_rows),)

    in_blk = block_rows * _round_up(w_in, _LANE) * itemsize
    out_blk = block_rows * _round_up(w_t, _LANE) * itemsize
    e_blk = _round_up(w_in, 8) * _round_up(w_t, _LANE) * itemsize
    vmem_limit = int(min(max(4 * (in_blk + out_blk) + 2 * e_blk + (2 << 20),
                             16 << 20), 64 << 20))

    cost = pl.CostEstimate(
        flops=2 * total_rows * w_in * w_t,
        transcendentals=0,
        bytes_accessed=(total_rows * w_in + total_rows * w_t + w_in * w_t) * itemsize,
    )

    out2d = pl.pallas_call(
        _col_expand_kernel,
        out_shape=jax.ShapeDtypeStruct((total_rows, w_t), compute_dtype),
        grid_spec=pltpu.PrefetchScalarGridSpec(
            num_scalar_prefetch=0,
            grid=grid,
            in_specs=[
                pl.BlockSpec((block_rows, w_in), lambda i: (i, 0)),  # x rows
                pl.BlockSpec((w_in, w_t), lambda i: (0, 0)),         # E_tiled (const)
            ],
            out_specs=pl.BlockSpec((block_rows, w_t), lambda i: (i, 0)),
        ),
        compiler_params=pltpu.CompilerParams(
            dimension_semantics=("parallel",),
            vmem_limit_bytes=vmem_limit,
        ),
        cost_estimate=cost,
    )(x2d, e)

    out = out2d.reshape(n, c, h_out, w_out)      # free, contiguous reshape
    if out.dtype != orig_dtype:
        out = out.astype(orig_dtype)
    return out


# ---------------------------------------------------------------------------
# General fallback: arbitrary (non-integer) row scale.  Batched one-hot matmuls.
# ---------------------------------------------------------------------------
def _upsample_general_kernel(x_ref, r_ref, e_ref, o_ref):
    x = x_ref[...].astype(jnp.float32)           # (B, H_in, W_in)
    b, h_in, w_in = x.shape
    h_out = r_ref.shape[0]
    w_out = e_ref.shape[1]
    # column expansion: fold batch into the M dim
    y = jnp.dot(
        x.reshape(b * h_in, w_in), e_ref[...],
        precision=lax.Precision.HIGHEST,
        preferred_element_type=jnp.float32,
    ).reshape(b, h_in, w_out)
    # row selection: batched one-hot matmul
    r = jnp.broadcast_to(r_ref[...][None], (b, h_out, h_in))
    out = jnp.einsum(
        'boh,bhw->bow', r, y,
        precision=lax.Precision.HIGHEST,
        preferred_element_type=jnp.float32,
    )
    o_ref[...] = out.astype(o_ref.dtype)


def _upsample_general(x, h_out, w_out):
    n, c, h_in, w_in = x.shape
    p = n * c

    rows = _nearest_rows(h_in, h_out)
    cols = _nearest_cols(w_in, w_out)
    r_np = np.zeros((h_out, h_in), dtype=np.float32)
    r_np[np.arange(h_out), rows] = 1.0
    e_np = np.zeros((w_in, w_out), dtype=np.float32)
    e_np[cols, np.arange(w_out)] = 1.0
    r = jnp.asarray(r_np)
    e = jnp.asarray(e_np)

    x3d = x.reshape(p, h_in, w_in)

    per_plane = (h_in * _round_up(w_in, _LANE) + h_out * _round_up(w_out, _LANE)) * 4
    bp = int(max(1, min(p, (4 << 20) // max(per_plane, 1))))
    if p >= 2 and bp > pl.cdiv(p, 2):
        bp = int(pl.cdiv(p, 2))
    grid = (pl.cdiv(p, bp),)

    out3d = pl.pallas_call(
        _upsample_general_kernel,
        out_shape=jax.ShapeDtypeStruct((p, h_out, w_out), x.dtype),
        grid_spec=pltpu.PrefetchScalarGridSpec(
            num_scalar_prefetch=0,
            grid=grid,
            in_specs=[
                pl.BlockSpec((bp, h_in, w_in), lambda i: (i, 0, 0)),
                pl.BlockSpec((h_out, h_in), lambda i: (0, 0)),
                pl.BlockSpec((w_in, w_out), lambda i: (0, 0)),
            ],
            out_specs=pl.BlockSpec((bp, h_out, w_out), lambda i: (i, 0, 0)),
        ),
        compiler_params=pltpu.CompilerParams(
            dimension_semantics=("parallel",),
            vmem_limit_bytes=48 << 20,
        ),
    )(x3d, r, e)

    return out3d.reshape(n, c, h_out, w_out)


# ---------------------------------------------------------------------------
# Public wrapper: Pallas equivalent of Upsample().forward(x, target_size)
# ---------------------------------------------------------------------------
def upsample_nearest(x, target_size):
    assert x.ndim == 4
    n, c, h_in, w_in = x.shape
    h_out, w_out = int(target_size[2]), int(target_size[3])

    if h_out % h_in == 0:
        return _upsample_rows_integer(x, h_out, w_out)
    return _upsample_general(x, h_out, w_out)


def _upsample_nearest_ref(x, target_size):
    """Pure-JAX reference matching F.interpolate(..., mode='nearest')."""
    n, c, h_in, w_in = x.shape
    h_out, w_out = int(target_size[2]), int(target_size[3])
    rows = (jnp.arange(h_out) * h_in) // h_out
    cols = (jnp.arange(w_out) * w_in) // w_out
    return x[:, :, rows, :][:, :, :, cols]


if __name__ == "__main__":
    key = jax.random.PRNGKey(0)
    N, C, H, W = 2, 4, 16, 16
    x = jax.random.normal(key, (N, C, H, W), dtype=jnp.float32)
    target_size = (N, C, 32, 32)   # 16x16 -> 32x32 (2x nearest)

    out = upsample_nearest(x, target_size)
    out = jax.block_until_ready(out)

    ref = _upsample_nearest_ref(x, target_size)
    assert out.shape == (N, C, 32, 32), out.shape
    assert out.dtype == x.dtype
    np.testing.assert_allclose(np.asarray(out), np.asarray(ref), rtol=0, atol=0)

    print("KERNEL_OK")
</pallas_src>

<mosaic_0001>
module attributes {stable_mosaic.version = 11 : i64} {
  func.func @_col_expand_kernel(%arg0: i32, %arg1: memref<64x16xf32, #tpu.memory_space<vmem>>, %arg2: memref<16x64xf32, #tpu.memory_space<vmem>>, %arg3: memref<64x64xf32, #tpu.memory_space<vmem>>) attributes {dimension_semantics = [#tpu.dimension_semantics<parallel>], iteration_bounds = array<i64: 2>, scalar_prefetch = 0 : i64, scratch_operands = 0 : i64, tpu.core_type = #tpu.core_type<tc>, window_params = [{transform_indices = @transform_0, window_bounds = array<i64: 64, 16>}, {pipeline_mode = #tpu.pipeline_mode<synchronous>, transform_indices = @transform_1, window_bounds = array<i64: 16, 64>}, {transform_indices = @transform_2, window_bounds = array<i64: 64, 64>}]} {
    %c0 = arith.constant 0 : index
    %c0_0 = arith.constant 0 : index
    %0 = vector.load %arg1[%c0, %c0_0] : memref<64x16xf32, #tpu.memory_space<vmem>>, vector<64x16xf32>
    %c0_1 = arith.constant 0 : index
    %c0_2 = arith.constant 0 : index
    %1 = vector.load %arg2[%c0_1, %c0_2] : memref<16x64xf32, #tpu.memory_space<vmem>>, vector<16x64xf32>
    %cst = arith.constant dense<0.000000e+00> : vector<64x64xf32>
    %2 = tpu.matmul %0, %1, %cst {dimension_numbers = #tpu.dot_dimension_numbers<[1], [0], [0], [1], [0, 0, 1, 1], [], []>, precision = #tpu.contract_precision<fp32>} : vector<64x16xf32>, vector<16x64xf32>, vector<64x64xf32> -> vector<64x64xf32>
    %c0_3 = arith.constant 0 : index
    %c0_4 = arith.constant 0 : index
    %3 = vector.load %arg3[%c0_3, %c0_4] : memref<64x64xf32, #tpu.memory_space<vmem>>, vector<64x64xf32>
    tpu.vector_store %arg3[%c0_3, %c0_4], %2 {strides = array<i32>} : memref<64x64xf32, #tpu.memory_space<vmem>>, vector<64x64xf32>,
    return
  }
  func.func @transform_0(%arg0: i32) -> (i32, i32) {
    %c0_i32 = arith.constant 0 : i32
    %c0_i32_0 = arith.constant 0 : i32
    return %arg0, %c0_i32 : i32, i32
  }
  func.func @transform_1(%arg0: i32) -> (i32, i32) {
    %c0_i32 = arith.constant 0 : i32
    %c0_i32_0 = arith.constant 0 : i32
    %c0_i32_1 = arith.constant 0 : i32
    return %c0_i32, %c0_i32_0 : i32, i32
  }
  func.func @transform_2(%arg0: i32) -> (i32, i32) {
    %c0_i32 = arith.constant 0 : i32
    %c0_i32_0 = arith.constant 0 : i32
    return %arg0, %c0_i32 : i32, i32
  }
}

</mosaic_0001>

<bundles_post_ra>
// kernel: tpu_custom_call.1
= control target key start
LH: loop header
LB: loop body
LE: loop exit
PB: predicated region body
PF: predicated region fallthrough
CT: control target
= control target key end

     0   :  { %s1269_s9 = smov 0   ;;  %s1426_s0 = inlined_call_operand.vmem [shape: f32[128,16], index: 0, kind: input, shape index: {}]   ;;  %s1427_s1 = inlined_call_operand.vmem [shape: f32[16,64], index: 1, kind: input, shape index: {}]   ;;  %s1428_s2 = inlined_call_operand.vmem [shape: f32[128,64], index: 2, kind: output, shape index: {}]  }
   0x1 LB: > { %s1007_s10 = sadd.s32 4294967295, %s1252_s9   ;;  %p1011_p0 = scmp.ge.s32.totalorder %s1252_s9, 1  ;;  %s1252_s9 = sphi %s1269_s9, %s12_s9  }
   0x2   : > { %p113_p1 = scmp.lt.s32.totalorder %s1252_s9, 3 }
   0x4   : > { %p114_p2 = pnand %p1011_p0, %p113_p1 }
   0x5   : > { %v155_v0 = vld [vmem:[%s1427_s1] sm:$0xff] (!%p114_p2)  ;;  %v156_v1 = vld [vmem:[%s1427_s1 + $0x8] sm:$0xff] (!%p114_p2)  ;;  %s1012_s15 = sshll.u32 (!%p114_p2), %s1007_s10, 3  ;;  %vm157_vm0 = vcmask (!%p114_p2), 130048   ;;  %vm942_vm1 = vcmask (!%p114_p2), 523264  }
   0x6   : > { %117 = sbr.rel (%p114_p2) target bundleno = 289 (0x121), region = 28  ;;  %v183_v2 = vand.u32 (!%p114_p2), 4294901760, %v155_v0  ;;  %v186_v3 = vand.u32 (!%p114_p2), 4294901760, %v156_v1  ;;  %p136_p3 = scmp.lt.s32.totalorder (!%p114_p2), %s1012_s15, 15 }
   0x8   : > { %v1283_v4 = vpack.c.bf16 (!%p114_p2), %v186_v3, %v183_v2  ;;  %v1287_v5 = vsub.f32 (!%p114_p2), %v155_v0, %v183_v2  ;;  %v1289_v6 = vsub.f32 (!%p114_p2), %v156_v1, %v186_v3 }
   0xa   : > { %1187 = vmatprep.subr.bf16.mxu0 (!%p114_p2), %v1283_v4  ;;  %1175 = vmatprep.subr.bf16.mxu1 (!%p114_p2), %v1283_v4  ;;  %v332_v7 = vand.u32 (!%p114_p2), 4294901760, %v1287_v5  ;;  %v339_v8 = vand.u32 (!%p114_p2), 4294901760, %v1289_v6  ;;  %v1182_v62 = vpack.c.bf16 (!%p114_p2), %v1289_v6, %v1287_v5 }
   0xb   : > { %1189 = vmatpush3.bf16.msra.mxu0 (!%p114_p2), %v1283_v4  ;;  %1177 = vmatpush3.bf16.msra.mxu1 (!%p114_p2), %v1283_v4 }
   0xc   : > { %v333_v11 = vsub.f32 (!%p114_p2), %v1287_v5, %v332_v7  ;;  %v340_v12 = vsub.f32 (!%p114_p2), %v1289_v6, %v339_v8  ;;  %v1190_v14 = vpack.c.bf16 (!%p114_p2), %v339_v8, %v332_v7 }
   0xd   : > { %s1430_s15 = smov (!%p136_p3, %s1012_s15), 15 }
   0xe   : > { %s1013_s16 = sshll.u32 %s1430_s15, 3  ;;  %v334_v23 = vand.u32 4294901760, %v333_v11  ;;  %v341_v24 = vand.u32 4294901760, %v340_v12  ;;  %1191 = vmatprep.subr.bf16.mxu0 %v1190_v14 }
   0xf   : > { %s139_s19 = scalar_lea.vmem %s1426_s0, %s1013_s16  ;;  %s1405_s22 = scalar_lea.vmem %s1428_s2, %s1013_s16 }
  0x10   : > { %v147_v9 = vld [vmem:[%s139_s19] sm:$0xff]  ;;  %v148_v10 = vld [vmem:[%s139_s19 + $0x8] sm:$0xff]  ;;  %v149_v13 = vld [vmem:[%s139_s19 + $0x10] sm:$0xff]  ;;  %v1178_v32 = vpack.c.bf16 %v341_v24, %v334_v23 }
  0x11   : > { %v159_v15 = vsel %vm157_vm0, %v147_v9, 0  ;;  %v162_v16 = vsel %vm157_vm0, %v148_v10, 0  ;;  %v165_v17 = vsel %vm157_vm0, %v149_v13, 0  ;;  %v150_v18 = vld [vmem:[%s139_s19 + $0x18] sm:$0xff]  ;;  %v151_v19 = vld [vmem:[%s139_s19 + $0x20] sm:$0xff]  ;;  %v152_v20 = vld [vmem:[%s139_s19 + $0x28] sm:$0xff] }
  0x12   : > { %v1308_v21 = vand.u32 4294901760, %v159_v15  ;;  %v1310_v22 = vand.u32 4294901760, %v162_v16  ;;  %v153_v25 = vld [vmem:[%s139_s19 + $0x30] sm:$0xff]  ;;  %v1312_v26 = vand.u32 4294901760, %v165_v17  ;;  %v168_v27 = vsel %vm157_vm0, %v150_v18, 0  ;;  %v154_v34 = vld [vmem:[%s139_s19 + $0x38] sm:$0xff]  ;;  %1179 = vmatprep.subr.bf16.mxu1 %v1178_v32 }
  0x13   : > { %v171_v28 = vsel %vm157_vm0, %v151_v19, 0  ;;  %v174_v29 = vsel %vm157_vm0, %v152_v20, 0  ;;  %v1323_v33 = vand.u32 4294901760, %v168_v27  ;;  %v177_v38 = vsel %vm157_vm0, %v153_v25, 0 }
  0x14   : > { %v1318_v30 = vsub.f32 %v159_v15, %v1308_v21  ;;  %v1321_v31 = vsub.f32 %v162_v16, %v1310_v22  ;;  %v1326_v35 = vsub.f32 %v165_v17, %v1312_v26  ;;  %v1328_v36 = vand.u32 4294901760, %v171_v28 }
  0x15   : > { %v1330_v37 = vand.u32 4294901760, %v174_v29  ;;  %v1336_v41 = vsub.f32 %v168_v27, %v1323_v33  ;;  %v1338_v42 = vand.u32 4294901760, %v177_v38  ;;  %v180_v46 = vsel %vm157_vm0, %v154_v34, 0 }
  0x16   : > { %v251_v39 = vand.u32 4294901760, %v1318_v30  ;;  %v261_v40 = vand.u32 4294901760, %v1321_v31  ;;  %v271_v43 = vand.u32 4294901760, %v1326_v35  ;;  %v1342_v44 = vsub.f32 %v171_v28, %v1328_v36 }
  0x17   : > { %v1345_v45 = vsub.f32 %v174_v29, %v1330_v37  ;;  %v281_v49 = vand.u32 4294901760, %v1336_v41  ;;  %v1352_v50 = vsub.f32 %v177_v38, %v1338_v42  ;;  %v1357_v54 = vand.u32 4294901760, %v180_v46 }
  0x18   : > { %1130 = vmatprep.mubr.f32.mxu0 %v251_v39  ;;  %v252_v47 = vsub.f32 %v1318_v30, %v251_v39  ;;  %v262_v48 = vsub.f32 %v1321_v31, %v261_v40  ;;  %v272_v51 = vsub.f32 %v1326_v35, %v271_v43  ;;  %v291_v52 = vand.u32 4294901760, %v1342_v44 }
  0x19   : > { %1131 = vmatmul.mubr.f32.vlgmr.msra.gmra.mrb[0].mxu0 %v261_v40  ;;  %v301_v53 = vand.u32 4294901760, %v1345_v45  ;;  %v282_v57 = vsub.f32 %v1336_v41, %v281_v49  ;;  %v311_v58 = vand.u32 4294901760, %v1352_v50  ;;  %v320_v61 = vsub.f32 %v180_v46, %v1357_v54 }
  0x1a   : > { %v253_v55 = vand.u32 4294901760, %v252_v47  ;;  %1133 = vmatprep.mubr.f32.mxu0 %v271_v43  ;;  %v263_v56 = vand.u32 4294901760, %v262_v48  ;;  %1193 = vmatpush3.bf16.msra.mxu0 %v1190_v14  ;;  %v273_v59 = vand.u32 4294901760, %v272_v51  ;;  %v292_v60 = vsub.f32 %v1342_v44, %v291_v52 }
  0x1b   : > { %1195 = vmatprep.subr.bf16.mxu0 %v1283_v4  ;;  %v283_v63 = vand.u32 4294901760, %v282_v57  ;;  %v302_v0 = vsub.f32 %v1345_v45, %v301_v53  ;;  %v321_v1 = vand.u32 4294901760, %v320_v61  ;;  %v312_v3 = vsub.f32 %v1352_v50, %v311_v58 }
  0x1c   : > { %1082 = vmatprep.mubr.f32.mxu1 %v253_v55  ;;  %v293_v2 = vand.u32 4294901760, %v292_v60 }
  0x1d   : > { %1083 = vmatmul.mubr.f32.vlgmr.msra.gmra.mrb[0].mxu1 %v263_v56  ;;  %1134 = vmatmul.mubr.f32.gmra.mrb[2].mxu0 %v281_v49  ;;  %v303_v7 = vand.u32 4294901760, %v302_v0  ;;  %v322_v5 = vsub.f32 %v320_v61, %v321_v1  ;;  %v313_v6 = vand.u32 4294901760, %v312_v3 }
  0x1e   : > { %1181 = vmatpush3.bf16.msra.mxu1 %v1178_v32  ;;  %1085 = vmatprep.mubr.f32.mxu1 %v273_v59 }
  0x1f   : > { %1136 = vmatprep.mubr.f32.mxu0 %v291_v52  ;;  %1183 = vmatprep.subr.bf16.mxu1 %v1182_v62  ;;  %v323_v8 = vand.u32 4294901760, %v322_v5 }
  0x21   : > { %1086 = vmatmul.mubr.f32.gmra.mrb[2].mxu1 %v283_v63  ;;  %1137 = vmatmul.mubr.f32.gmra.mrb[4].mxu0 %v301_v53 }
  0x22   : > { %1088 = vmatprep.mubr.f32.mxu1 %v293_v2  ;;  %1139 = vmatprep.mubr.f32.mxu0 %v311_v58 }
  0x25   : > { %1089 = vmatmul.mubr.f32.gmra.mrb[4].mxu1 %v303_v7  ;;  %1140 = vmatmul.mubr.f32.gmra.mrb[6].mxu0 %v321_v1 }
  0x26   : > { %1091 = vmatprep.mubr.f32.mxu1 %v313_v6  ;;  %1146 = vmatprep.mubr.f32.mxu0 %v1308_v21 }
  0x29   : > { %1092 = vmatmul.mubr.f32.gmra.mrb[6].mxu1 %v323_v8  ;;  %1147 = vmatmul.mubr.f32.vlgmr.msra.gmra.mrb[0].mxu0 %v1310_v22 }
  0x2a   : > { %1098 = vmatprep.mubr.f32.mxu1 %v1308_v21  ;;  %1149 = vmatprep.mubr.f32.mxu0 %v1312_v26 }
  0x2b   : > { %1197 = vmatpush3.bf16.msra.mxu0 %v1283_v4 }
  0x2d   : > { %1099 = vmatmul.mubr.f32.vlgmr.msra.gmra.mrb[0].mxu1 %v1310_v22  ;;  %1150 = vmatmul.mubr.f32.gmra.mrb[2].mxu0 %v1323_v33 }
  0x2e   : > { %1185 = vmatpush3.bf16.msra.mxu1 %v1182_v62  ;;  %1101 = vmatprep.mubr.f32.mxu1 %v1312_v26 }
  0x2f   : > { %1152 = vmatprep.mubr.f32.mxu0 %v1328_v36 }
  0x31   : > { %1102 = vmatmul.mubr.f32.gmra.mrb[2].mxu1 %v1323_v33  ;;  %1153 = vmatmul.mubr.f32.gmra.mrb[4].mxu0 %v1330_v37 }
  0x32   : > { %1104 = vmatprep.mubr.f32.mxu1 %v1328_v36  ;;  %1155 = vmatprep.mubr.f32.mxu0 %v1338_v42 }
  0x35   : > { %1105 = vmatmul.mubr.f32.gmra.mrb[4].mxu1 %v1330_v37  ;;  %1156 = vmatmul.mubr.f32.gmra.mrb[6].mxu0 %v1357_v54 }
  0x36   : > { %1107 = vmatprep.mubr.f32.mxu1 %v1338_v42  ;;  %1162 = vmatprep.mubr.f32.mxu0 %v1308_v21 }
  0x39   : > { %1108 = vmatmul.mubr.f32.gmra.mrb[6].mxu1 %v1357_v54  ;;  %1163 = vmatmul.mubr.f32.vlgmr.msra.gmra.mrb[0].mxu0 %v1310_v22 }
  0x3a   : > { %1114 = vmatprep.mubr.f32.mxu1 %v1318_v30  ;;  %1165 = vmatprep.mubr.f32.mxu0 %v1312_v26 }
  0x3d   : > { %1115 = vmatmul.mubr.f32.vlgmr.msra.gmra.mrb[0].mxu1 %v1321_v31  ;;  %1166 = vmatmul.mubr.f32.gmra.mrb[2].mxu0 %v1323_v33 }
  0x3e   : > { %1117 = vmatprep.mubr.f32.mxu1 %v1326_v35  ;;  %1168 = vmatprep.mubr.f32.mxu0 %v1328_v36 }
  0x41   : > { %1118 = vmatmul.mubr.f32.gmra.mrb[2].mxu1 %v1336_v41  ;;  %1169 = vmatmul.mubr.f32.gmra.mrb[4].mxu0 %v1330_v37 }
  0x42   : > { %1120 = vmatprep.mubr.f32.mxu1 %v1342_v44  ;;  %1171 = vmatprep.mubr.f32.mxu0 %v1338_v42 }
  0x45   : > { %1121 = vmatmul.mubr.f32.gmra.mrb[4].mxu1 %v1345_v45  ;;  %1172 = vmatmul.mubr.f32.gmra.mrb[6].mxu0 %v1357_v54 }
  0x46   : > { %1123 = vmatprep.mubr.f32.mxu1 %v1352_v50 }
  0x49   : > { %1124 = vmatmul.mubr.f32.gmra.mrb[6].mxu1 %v320_v61 }
 0x10c   : > { %v1164_v4 = vpop.f32.mrb[0].mxu0 }
 0x10d   : > { %v896_v9 = vpop.f32.mrb[1].mxu0 }
 0x110   : > { %v1116_v10 = vpop.f32.mrb[0].mxu1  ;;  %v1167_v11 = vpop.f32.mrb[2].mxu0 }
 0x111   : > { %v1198_v12 = vadd.f32 %v1164_v4, %v1116_v10  ;;  %v524_v13 = vpop.f32.mrb[1].mxu1  ;;  %v908_v14 = vpop.f32.mrb[3].mxu0 }
 0x112   : > { %v1199_v15 = vadd.f32 %v896_v9, %v524_v13 }
 0x113   : > { %944 = vst.msk [vmem:[%s1405_s22 + $0x8] sm:$0xff] %vm942_vm1, %v1198_v12 }
 0x114   : > { %943 = vst.msk [vmem:[%s1405_s22] sm:$0xff] %vm942_vm1, %v1199_v15  ;;  %v1119_v16 = vpop.f32.mrb[2].mxu1  ;;  %v1170_v17 = vpop.f32.mrb[4].mxu0 }
 0x115   : > { %v1200_v18 = vadd.f32 %v1167_v11, %v1119_v16  ;;  %v538_v19 = vpop.f32.mrb[3].mxu1  ;;  %v920_v20 = vpop.f32.mrb[5].mxu0 }
 0x116   : > { %v1201_v21 = vadd.f32 %v908_v14, %v538_v19 }
 0x117   : > { %946 = vst.msk [vmem:[%s1405_s22 + $0x18] sm:$0xff] %vm942_vm1, %v1200_v18 }
 0x118   : > { %945 = vst.msk [vmem:[%s1405_s22 + $0x10] sm:$0xff] %vm942_vm1, %v1201_v21  ;;  %v1122_v22 = vpop.f32.mrb[4].mxu1  ;;  %v1173_v23 = vpop.f32.mrb[6].mxu0 }
 0x119   : > { %v1202_v24 = vadd.f32 %v1170_v17, %v1122_v22  ;;  %v552_v25 = vpop.f32.mrb[5].mxu1  ;;  %v932_v26 = vpop.f32.mrb[7].mxu0 }
 0x11a   : > { %v1203_v27 = vadd.f32 %v920_v20, %v552_v25 }
 0x11b   : > { %948 = vst.msk [vmem:[%s1405_s22 + $0x28] sm:$0xff] %vm942_vm1, %v1202_v24 }
 0x11c   : > { %947 = vst.msk [vmem:[%s1405_s22 + $0x20] sm:$0xff] %vm942_vm1, %v1203_v27  ;;  %v1125_v28 = vpop.f32.mrb[6].mxu1 }
 0x11d   : > { %v1204_v29 = vadd.f32 %v1173_v23, %v1125_v28  ;;  %v566_v30 = vpop.f32.mrb[7].mxu1 }
 0x11e   : > { %v1205_v31 = vadd.f32 %v932_v26, %v566_v30 }
 0x11f   : > { %950 = vst.msk [vmem:[%s1405_s22 + $0x38] sm:$0xff] %vm942_vm1, %v1204_v29 }
 0x120   : > { %949 = vst.msk [vmem:[%s1405_s22 + $0x30] sm:$0xff] %vm942_vm1, %v1205_v31 }
 0x121 PF: > { %s12_s9 = sadd.s32 1, %s1252_s9  }
 0x122   : > { %p9_p4 = scmp.ge.s32.totalorder %s12_s9, 4  }
 0x124   :  { %11 = sbr.rel (!%p9_p4) target bundleno = 1 (0x1), region = 58 }

</bundles_post_ra>
